<compile_context>
chip_gen: v5e
topology: v5e:2x2
jax: 0.10.0
libtpu: 0.0.40
codegen_flags: <defaults>
</compile_context>

<pallas_src>
import functools

import jax
import jax.numpy as jnp
from jax import lax
from jax.experimental import pallas as pl
from jax.experimental.pallas import tpu as pltpu

_EPS = 1e-6  # F.pairwise_distance default eps (added to the difference)


def _triplet_kernel(sel_ref, a_ref, p_ref, n_ref, out_ref, *,
                    margin, k, tile_rows, total_n, num_tiles):
    """One packed row-tile -> one (1, 8, 128) partial-sum output block.

    sel_ref           : (W, 128) f32 selector, VMEM-resident (constant index map)
    a_ref/p_ref/n_ref : (TILE_ROWS, W) VMEM tiles in the input's native dtype
    out_ref           : (1, 8, 128) f32 partial-sum slab for this tile
    """
    i = pl.program_id(0)

    # Upcast in-kernel (inputs are streamed in their native dtype over HBM).
    a = a_ref[...].astype(jnp.float32)
    p = p_ref[...].astype(jnp.float32)
    n = n_ref[...].astype(jnp.float32)

    dp = a - p + _EPS
    dn = a - n + _EPS

    # Per-row sum of squares on the idle MXU.  Column c of the selector sums
    # the D real lanes of packed sub-row (c % k), so every column holds a
    # valid row's sum (each original row replicated 128 // k times).
    sel = sel_ref[...]
    pos_sq = jnp.dot(dp * dp, sel, precision=lax.Precision.HIGHEST,
                     preferred_element_type=jnp.float32)   # (TILE, 128)
    neg_sq = jnp.dot(dn * dn, sel, precision=lax.Precision.HIGHEST,
                     preferred_element_type=jnp.float32)   # (TILE, 128)

    loss = jnp.maximum(jnp.sqrt(pos_sq) - jnp.sqrt(neg_sq) + margin, 0.0)

    def _store(x):
        # Reduce (TILE, 128) -> (8, 128) along full vreg tiles (pure VALU adds,
        # sublane-aligned reshape, no cross-lane XLU work), lane-dense store.
        slab = jnp.sum(x.reshape(tile_rows // 8, 8, 128), axis=0)
        out_ref[...] = slab.reshape(1, 8, 128)

    @pl.when(i < num_tiles - 1)
    def _():
        # Interior tiles: every row/column is valid, no masking work at all.
        _store(loss)

    @pl.when(i == num_tiles - 1)
    def _():
        # Tail tile only: mask packing-pad rows and rows past the array end
        # (possibly garbage/NaN -> must use where, not a 0/1 multiply).
        r = lax.broadcasted_iota(jnp.int32, loss.shape, 0)
        c = lax.broadcasted_iota(jnp.int32, loss.shape, 1)
        orig_row = (i * tile_rows + r) * k + (c % k)
        _store(jnp.where(orig_row < total_n, loss, 0.0))


def triplet_loss(anchor, positive, negative, margin=1.0, max_tile_rows=None):
    """Pallas TPU implementation of TripletLoss.forward. Returns a scalar f32.

    `max_tile_rows` is a testing/override knob to force multi-tile grids at
    small N; leave None in production.
    """
    assert anchor.shape == positive.shape == negative.shape
    assert anchor.ndim == 2
    N, D = anchor.shape
    in_dtype = anchor.dtype
    itemsize = jnp.dtype(in_dtype).itemsize

    # ---- Lane-packing geometry -------------------------------------------
    if D < 128:
        d_pad = 1
        while d_pad < D:          # next power of two >= D; divides 128
            d_pad *= 2
        k = 128 // d_pad
        W = 128
    else:
        d_pad = D
        k = 1
        W = D

    a, p, n = anchor, positive, negative      # NOTE: no f32 upcast here.
    if k > 1:
        n_pack = -(-N // k)
        pad_rows = n_pack * k - N
        pad_cols = d_pad - D
        if pad_rows or pad_cols:
            cfg = ((0, pad_rows), (0, pad_cols))
            a = jnp.pad(a, cfg)
            p = jnp.pad(p, cfg)
            n = jnp.pad(n, cfg)
        a = a.reshape(n_pack, W)
        p = p.reshape(n_pack, W)
        n = n.reshape(n_pack, W)
    else:
        n_pack = N

    # ---- Hoisted selector (built once, VMEM-resident inside the kernel) ---
    lane = jnp.arange(W, dtype=jnp.int32)[:, None]
    col = jnp.arange(128, dtype=jnp.int32)[None, :]
    sub = col % k
    sel = ((lane >= sub * d_pad) & (lane < sub * d_pad + D)).astype(jnp.float32)
    sel_bytes = W * 128 * 4

    # ---- Generation-aware tile sizing -------------------------------------
    # Sublane packing of the streamed dtype: 8 (f32), 16 (bf16/f16), 32 (8-bit).
    sub_mult = 8 * max(1, 4 // itemsize)

    try:
        vmem_cap = int(pltpu.get_tpu_info().vmem_capacity_bytes)
    except Exception:
        vmem_cap = 64 * 1024 * 1024          # v7x per-TC VMEM: safe everywhere
    vmem_limit = max(32 * 1024 * 1024,
                     min(int(vmem_cap * 0.70), 100 * 1024 * 1024))

    # Per packed row: 3 inputs x 2 pipeline buffers (native dtype) + in-kernel
    # f32 temporaries (upcasts/diffs/squares ~ 8 x W) + 128-wide slabs.
    per_row = 3 * 2 * W * itemsize + 8 * W * 4 + 8 * 128 * 4
    tile_budget = int(vmem_limit * 0.80) - sel_bytes
    tile_rows = max(sub_mult, (tile_budget // per_row) // sub_mult * sub_mult)
    tile_rows = min(tile_rows, -(-n_pack // sub_mult) * sub_mult)
    if max_tile_rows is not None:
        tile_rows = max(sub_mult, min(tile_rows,
                                      (max_tile_rows // sub_mult) * sub_mult))
    num_tiles = -(-n_pack // tile_rows)

    kernel = functools.partial(_triplet_kernel, margin=float(margin), k=k,
                               tile_rows=tile_rows, total_n=N,
                               num_tiles=num_tiles)

    sel_spec = pl.BlockSpec((W, 128), lambda i: (0, 0))
    row_spec = pl.BlockSpec((tile_rows, W), lambda i: (i, 0))

    partials = pl.pallas_call(
        kernel,
        out_shape=jax.ShapeDtypeStruct((num_tiles, 8, 128), jnp.float32),
        grid_spec=pltpu.PrefetchScalarGridSpec(
            num_scalar_prefetch=0,
            grid=(num_tiles,),
            in_specs=[sel_spec, row_spec, row_spec, row_spec],
            out_specs=pl.BlockSpec((1, 8, 128), lambda i: (i, 0, 0)),
        ),
        compiler_params=pltpu.CompilerParams(
            dimension_semantics=("parallel",),   # independent per-tile partials
            vmem_limit_bytes=vmem_limit,
        ),
    )(sel, a, p, n)

    # Each original row's loss is replicated 128 // k times across selector
    # columns; fold that into the mean.  Tiny reduction stays in plain JAX.
    rep = 128 // k
    return jnp.sum(partials) / jnp.float32(N * rep)


def _reference_triplet_loss(anchor, positive, negative, margin=1.0):
    """Pure-JAX reference matching F.pairwise_distance semantics."""
    pos = jnp.sqrt(jnp.sum((anchor - positive + _EPS) ** 2, axis=-1))
    neg = jnp.sqrt(jnp.sum((anchor - negative + _EPS) ** 2, axis=-1))
    return jnp.mean(jnp.maximum(pos - neg + margin, 0.0))


if __name__ == "__main__":
    key = jax.random.PRNGKey(0)
    keys = jax.random.split(key, 15)

    def check(a, p, n, tag, **kw):
        out = triplet_loss(a, p, n, margin=1.0, **kw)
        jax.block_until_ready(out)
        ref = _reference_triplet_loss(a.astype(jnp.float32),
                                      p.astype(jnp.float32),
                                      n.astype(jnp.float32), margin=1.0)
        assert jnp.allclose(out, ref, rtol=1e-4, atol=1e-5), (tag, out, ref)

    # Case 1: small pow2 embeddings (D=32 -> k=4 lane packing), N % k != 0.
    a1 = jax.random.normal(keys[0], (10, 32), jnp.float32)
    p1 = jax.random.normal(keys[1], (10, 32), jnp.float32)
    n1 = jax.random.normal(keys[2], (10, 32), jnp.float32)
    check(a1, p1, n1, "case1")

    # Case 2: wide embeddings (D=256 -> k=1, MXU ones-reduction), N % 8 != 0.
    a2 = jax.random.normal(keys[3], (20, 256), jnp.float32)
    p2 = jax.random.normal(keys[4], (20, 256), jnp.float32)
    n2 = jax.random.normal(keys[5], (20, 256), jnp.float32)
    check(a2, p2, n2, "case2")

    # Case 3: bf16 inputs streamed natively (in-kernel f32 upcast), D=128.
    a3 = jax.random.normal(keys[6], (24, 128), jnp.float32).astype(jnp.bfloat16)
    p3 = jax.random.normal(keys[7], (24, 128), jnp.float32).astype(jnp.bfloat16)
    n3 = jax.random.normal(keys[8], (24, 128), jnp.float32).astype(jnp.bfloat16)
    check(a3, p3, n3, "case3")

    # Case 4: D=48 (128 % D != 0 -> pad features to 64, k=2), odd N.
    a4 = jax.random.normal(keys[9], (13, 48), jnp.float32)
    p4 = jax.random.normal(keys[10], (13, 48), jnp.float32)
    n4 = jax.random.normal(keys[11], (13, 48), jnp.float32)
    check(a4, p4, n4, "case4")

    # Case 5: force a multi-tile grid to exercise the non-tail (unmasked) path.
    a5 = jax.random.normal(keys[12], (20, 256), jnp.float32)
    p5 = jax.random.normal(keys[13], (20, 256), jnp.float32)
    n5 = jax.random.normal(keys[14], (20, 256), jnp.float32)
    check(a5, p5, n5, "case5", max_tile_rows=8)

    print("KERNEL_OK")
</pallas_src>

<mosaic_0001>
module attributes {stable_mosaic.version = 11 : i64} {
  func.func @_triplet_kernel(%arg0: i32, %arg1: memref<128x128xf32, #tpu.memory_space<vmem>>, %arg2: memref<8x128xf32, #tpu.memory_space<vmem>>, %arg3: memref<8x128xf32, #tpu.memory_space<vmem>>, %arg4: memref<8x128xf32, #tpu.memory_space<vmem>>, %arg5: memref<1x8x128xf32, #tpu.memory_space<vmem>>) attributes {dimension_semantics = [#tpu.dimension_semantics<parallel>], iteration_bounds = array<i64: 1>, scalar_prefetch = 0 : i64, scratch_operands = 0 : i64, tpu.core_type = #tpu.core_type<tc>, window_params = [{pipeline_mode = #tpu.pipeline_mode<synchronous>, transform_indices = @transform_0, window_bounds = array<i64: 128, 128>}, {transform_indices = @transform_1, window_bounds = array<i64: 8, 128>}, {transform_indices = @transform_2, window_bounds = array<i64: 8, 128>}, {transform_indices = @transform_3, window_bounds = array<i64: 8, 128>}, {transform_indices = @transform_4, window_bounds = array<i64: 1, 8, 128>}]} {
    %c0 = arith.constant 0 : index
    %c0_0 = arith.constant 0 : index
    %0 = vector.load %arg2[%c0, %c0_0] : memref<8x128xf32, #tpu.memory_space<vmem>>, vector<8x128xf32>
    %c0_1 = arith.constant 0 : index
    %c0_2 = arith.constant 0 : index
    %1 = vector.load %arg3[%c0_1, %c0_2] : memref<8x128xf32, #tpu.memory_space<vmem>>, vector<8x128xf32>
    %c0_3 = arith.constant 0 : index
    %c0_4 = arith.constant 0 : index
    %2 = vector.load %arg4[%c0_3, %c0_4] : memref<8x128xf32, #tpu.memory_space<vmem>>, vector<8x128xf32>
    %3 = arith.subf %0, %1 : vector<8x128xf32>
    %cst = arith.constant 9.99999997E-7 : f32
    %4 = vector.broadcast %cst : f32 to vector<8x128xf32>
    %5 = arith.addf %3, %4 : vector<8x128xf32>
    %6 = arith.subf %0, %2 : vector<8x128xf32>
    %cst_5 = arith.constant 9.99999997E-7 : f32
    %7 = vector.broadcast %cst_5 : f32 to vector<8x128xf32>
    %8 = arith.addf %6, %7 : vector<8x128xf32>
    %c0_6 = arith.constant 0 : index
    %c0_7 = arith.constant 0 : index
    %9 = vector.load %arg1[%c0_6, %c0_7] : memref<128x128xf32, #tpu.memory_space<vmem>>, vector<128x128xf32>
    %10 = arith.mulf %5, %5 : vector<8x128xf32>
    %cst_8 = arith.constant dense<0.000000e+00> : vector<8x128xf32>
    %11 = tpu.matmul %10, %9, %cst_8 {dimension_numbers = #tpu.dot_dimension_numbers<[1], [0], [0], [1], [0, 0, 1, 1], [], []>, precision = #tpu.contract_precision<fp32>} : vector<8x128xf32>, vector<128x128xf32>, vector<8x128xf32> -> vector<8x128xf32>
    %12 = arith.mulf %8, %8 : vector<8x128xf32>
    %cst_9 = arith.constant dense<0.000000e+00> : vector<8x128xf32>
    %13 = tpu.matmul %12, %9, %cst_9 {dimension_numbers = #tpu.dot_dimension_numbers<[1], [0], [0], [1], [0, 0, 1, 1], [], []>, precision = #tpu.contract_precision<fp32>} : vector<8x128xf32>, vector<128x128xf32>, vector<8x128xf32> -> vector<8x128xf32>
    %14 = math.sqrt %11 : vector<8x128xf32>
    %15 = math.sqrt %13 : vector<8x128xf32>
    %16 = arith.subf %14, %15 : vector<8x128xf32>
    %cst_10 = arith.constant 1.000000e+00 : f32
    %17 = vector.broadcast %cst_10 : f32 to vector<8x128xf32>
    %18 = arith.addf %16, %17 : vector<8x128xf32>
    %cst_11 = arith.constant 0.000000e+00 : f32
    %19 = vector.broadcast %cst_11 : f32 to vector<8x128xf32>
    %20 = arith.maximumf %18, %19 : vector<8x128xf32>
    %c0_i32 = arith.constant 0 : i32
    %21 = arith.cmpi slt, %arg0, %c0_i32 : i32
    %22 = arith.extui %21 : i1 to i32
    %c0_i32_12 = arith.constant 0 : i32
    %23 = arith.cmpi ne, %22, %c0_i32_12 : i32
    scf.if %23 {
      %27 = vector.shape_cast %20 : vector<8x128xf32> to vector<1x8x128xf32>
      %cst_15 = arith.constant dense<0.000000e+00> : vector<8x128xf32>
      %28 = vector.multi_reduction <add>, %27, %cst_15 [0] : vector<1x8x128xf32> to vector<8x128xf32>
      %29 = vector.shape_cast %28 : vector<8x128xf32> to vector<1x8x128xf32>
      %c0_16 = arith.constant 0 : index
      %c0_17 = arith.constant 0 : index
      %c0_18 = arith.constant 0 : index
      %30 = vector.load %arg5[%c0_16, %c0_17, %c0_18] : memref<1x8x128xf32, #tpu.memory_space<vmem>>, vector<1x8x128xf32>
      tpu.vector_store %arg5[%c0_16, %c0_17, %c0_18], %29 {strides = array<i32>} : memref<1x8x128xf32, #tpu.memory_space<vmem>>, vector<1x8x128xf32>,
    } else {
    }
    %c0_i32_13 = arith.constant 0 : i32
    %24 = arith.cmpi eq, %arg0, %c0_i32_13 : i32
    %25 = arith.extui %24 : i1 to i32
    %c0_i32_14 = arith.constant 0 : i32
    %26 = arith.cmpi ne, %25, %c0_i32_14 : i32
    scf.if %26 {
      %27 = tpu.iota {dimensions = array<i32: 0>} : vector<8x128xi32>
      %28 = tpu.iota {dimensions = array<i32: 1>} : vector<8x128xi32>
      %c8_i32 = arith.constant 8 : i32
      %29 = arith.muli %arg0, %c8_i32 : i32
      %30 = vector.broadcast %29 : i32 to vector<8x128xi32>
      %31 = arith.addi %30, %27 : vector<8x128xi32>
      %c4_i32 = arith.constant 4 : i32
      %32 = vector.broadcast %c4_i32 : i32 to vector<8x128xi32>
      %33 = arith.muli %31, %32 : vector<8x128xi32>
      %c4_i32_15 = arith.constant 4 : i32
      %c0_i32_16 = arith.constant 0 : i32
      %34 = arith.cmpi eq, %c4_i32_15, %c0_i32_16 : i32
      %c1_i32 = arith.constant 1 : i32
      %35 = arith.select %34, %c1_i32, %c4_i32_15 : i32
      %36 = vector.broadcast %35 : i32 to vector<8x128xi32>
      %37 = arith.remsi %28, %36 : vector<8x128xi32>
      %c0_i32_17 = arith.constant 0 : i32
      %38 = vector.broadcast %c0_i32_17 : i32 to vector<8x128xi32>
      %39 = arith.cmpi ne, %37, %38 : vector<8x128xi32>
      %c0_i32_18 = arith.constant 0 : i32
      %40 = vector.broadcast %c0_i32_18 : i32 to vector<8x128xi32>
      %41 = arith.cmpi slt, %37, %40 : vector<8x128xi32>
      %c0_i32_19 = arith.constant 0 : i32
      %42 = arith.cmpi slt, %35, %c0_i32_19 : i32
      %43 = vector.broadcast %42 : i1 to vector<8x128xi1>
      %44 = vector.broadcast %43 : vector<8x128xi1> to vector<8x128xi1>
      %45 = arith.xori %41, %44 : vector<8x128xi1>
      %46 = arith.andi %45, %39 : vector<8x128xi1>
      %47 = vector.broadcast %35 : i32 to vector<8x128xi32>
      %48 = arith.addi %37, %47 : vector<8x128xi32>
      %49 = arith.select %46, %48, %37 : vector<8x128xi1>, vector<8x128xi32>
      %50 = arith.addi %33, %49 : vector<8x128xi32>
      %c10_i32 = arith.constant 10 : i32
      %51 = vector.broadcast %c10_i32 : i32 to vector<8x128xi32>
      %52 = arith.cmpi slt, %50, %51 : vector<8x128xi32>
      %cst_20 = arith.constant 0.000000e+00 : f32
      %53 = vector.broadcast %cst_20 : f32 to vector<8x128xf32>
      %54 = arith.select %52, %20, %53 : vector<8x128xi1>, vector<8x128xf32>
      %55 = vector.shape_cast %54 : vector<8x128xf32> to vector<1x8x128xf32>
      %cst_21 = arith.constant dense<0.000000e+00> : vector<8x128xf32>
      %56 = vector.multi_reduction <add>, %55, %cst_21 [0] : vector<1x8x128xf32> to vector<8x128xf32>
      %57 = vector.shape_cast %56 : vector<8x128xf32> to vector<1x8x128xf32>
      %c0_22 = arith.constant 0 : index
      %c0_23 = arith.constant 0 : index
      %c0_24 = arith.constant 0 : index
      %58 = vector.load %arg5[%c0_22, %c0_23, %c0_24] : memref<1x8x128xf32, #tpu.memory_space<vmem>>, vector<1x8x128xf32>
      tpu.vector_store %arg5[%c0_22, %c0_23, %c0_24], %57 {strides = array<i32>} : memref<1x8x128xf32, #tpu.memory_space<vmem>>, vector<1x8x128xf32>,
    } else {
    }
    return
  }
  func.func @transform_0(%arg0: i32) -> (i32, i32) {
    %c0_i32 = arith.constant 0 : i32
    %c0_i32_0 = arith.constant 0 : i32
    %c0_i32_1 = arith.constant 0 : i32
    return %c0_i32, %c0_i32_0 : i32, i32
  }
  func.func @transform_1(%arg0: i32) -> (i32, i32) {
    %c0_i32 = arith.constant 0 : i32
    %c0_i32_0 = arith.constant 0 : i32
    return %arg0, %c0_i32 : i32, i32
  }
  func.func @transform_2(%arg0: i32) -> (i32, i32) {
    %c0_i32 = arith.constant 0 : i32
    %c0_i32_0 = arith.constant 0 : i32
    return %arg0, %c0_i32 : i32, i32
  }
  func.func @transform_3(%arg0: i32) -> (i32, i32) {
    %c0_i32 = arith.constant 0 : i32
    %c0_i32_0 = arith.constant 0 : i32
    return %arg0, %c0_i32 : i32, i32
  }
  func.func @transform_4(%arg0: i32) -> (i32, i32, i32) {
    %c0_i32 = arith.constant 0 : i32
    %c0_i32_0 = arith.constant 0 : i32
    %c0_i32_1 = arith.constant 0 : i32
    return %arg0, %c0_i32, %c0_i32_0 : i32, i32, i32
  }
}

</mosaic_0001>

<bundles_post_ra>
// kernel: tpu_custom_call.1
= control target key start
LH: loop header
LB: loop body
LE: loop exit
PB: predicated region body
PF: predicated region fallthrough
CT: control target
= control target key end

     0   :  { %9 = vsyncpa [#allocation3], 0  ;;  %s1459_s0 = inlined_call_operand.hbm [shape: f32[128,128], index: 0, kind: input, shape index: {}]   ;;  %s1460_s1 = inlined_call_operand.hbm [shape: f32[3,128], index: 1, kind: input, shape index: {}]   ;;  %s1461_s2 = inlined_call_operand.hbm [shape: f32[3,128], index: 2, kind: input, shape index: {}]   ;;  %s1462_s3 = inlined_call_operand.hbm [shape: f32[3,128], index: 3, kind: input, shape index: {}]   ;;  %s1463_s4 = inlined_call_operand.hbm [shape: f32[1,8,128], index: 4, kind: output, shape index: {}]  }
   0x1   :  { %10 = vsyncpa [#allocation6], 0 }
   0x2   :  { %11 = vsyncpa [#allocation9], 0 }
   0x3   :  { %12 = vsyncpa [#allocation4], 0  ;;  %s17_s17 = sshll.u32 %s1459_s0, 4  ;;  %s1010_s18 = smov [#allocation2]   ;;  %s18_s17 = int_to_ptr.hbm [resolvable:$true] %s17_s17 }
   0x4   :  { %s19_s19 = sshll.u32 %s1010_s18, 4  ;;  %s1011_s20 = smov 128   ;;  %s20_s19 = int_to_ptr.vmem [resolvable:$true] %s19_s19 }
   0x5   :  { %s1012_s21 = smov 8  }
   0x6   :  { %25 = dma.hbm_to_vmem [thread:$0]  %s18_s17, 2048, %s20_s19, [#allocation3], %s1011_s20, %s1011_s20, %s1012_s21  }
   0x7   :  { %29 = vsyncadd [#allocation6], 64  ;;  %s30_s24 = sshll.u32 %s1460_s1, 4  ;;  %s1013_s25 = smov [#allocation5]   ;;  %s31_s24 = int_to_ptr.hbm [resolvable:$true] %s30_s24 }
   0x8   :  { %s32_s26 = sshll.u32 %s1013_s25, 4  ;;  %s1014_s27 = smov 64   ;;  %s33_s26 = int_to_ptr.vmem [resolvable:$true] %s32_s26 }
   0x9   :  { %s1015_s28 = smov 4  }
   0xa   :  { %38 = dma.hbm_to_vmem [thread:$0]  %s31_s24, 64, %s33_s26, [#allocation6], %s1014_s27, %s1014_s27, %s1015_s28  }
   0xb   :  { %42 = vsyncadd [#allocation6], 64  ;;  %s43_s30 = sshll.u32 %s1461_s2, 4  ;;  %s1016_s5 = smov [#allocation7]   ;;  %s44_s30 = int_to_ptr.hbm [resolvable:$true] %s43_s30 }
   0xc   :  { %s45_s6 = sshll.u32 %s1016_s5, 4  ;;  %s46_s6 = int_to_ptr.vmem [resolvable:$true] %s45_s6 }
   0xd   :  { %51 = dma.hbm_to_vmem [thread:$0]  %s44_s30, 64, %s46_s6, [#allocation6], %s1014_s27, %s1014_s27, %s1015_s28  }
   0xe   :  { %55 = vsyncadd [#allocation9], 64  ;;  %s56_s8 = sshll.u32 %s1462_s3, 4  ;;  %s1017_s9 = smov [#allocation8]   ;;  %s57_s8 = int_to_ptr.hbm [resolvable:$true] %s56_s8 }
   0xf   :  { %s58_s10 = sshll.u32 %s1017_s9, 4  ;;  %s59_s10 = int_to_ptr.vmem [resolvable:$true] %s58_s10 }
  0x10   :  { %64 = dma.hbm_to_vmem [thread:$0]  %s57_s8, 64, %s59_s10, [#allocation9], %s1014_s27, %s1014_s27, %s1015_s28  }
  0x11   :  { %1002 = dma.done.wait [#allocation3], 2048  }
  0x12   :  { %1003 = vsyncadd [#allocation3], 4294965248 }
  0x13   :  { %1004 = dma.done.wait [#allocation6], 256  }
  0x14   :  { %1005 = vsyncadd [#allocation6], 4294967040 }
  0x15   :  { %1006 = dma.done.wait [#allocation9], 128  }
  0x16   :  { %1007 = vsyncadd [#allocation9], 4294967168  ;;  %v103_v0 = vld [vmem:[#allocation2 + $0x78] sm:$0xff]  ;;  %v102_v1 = vld [vmem:[#allocation2 + $0x70] sm:$0xff]  ;;  %s1018_s2 = smov [#allocation10]   ;;  %s857_s13 = sshll.u32 %s1463_s4, 4  ;;  %s858_s13 = int_to_ptr.hbm [resolvable:$true] %s857_s13 }
  0x17   :  { %v101_v2 = vld [vmem:[#allocation2 + $0x68] sm:$0xff]  ;;  %v1056_v3 = vand.u32 4294901760, %v103_v0  ;;  %v1058_v4 = vand.u32 4294901760, %v102_v1  ;;  %v100_v6 = vld [vmem:[#allocation2 + $0x60] sm:$0xff]  ;;  %v99_v7 = vld [vmem:[#allocation2 + $0x58] sm:$0xff]  ;;  %s855_s3 = sshll.u32 %s1018_s2, 4  ;;  %s856_s3 = int_to_ptr.vmem [resolvable:$true] %s855_s3 }
  0x18   :  { %v1060_v5 = vand.u32 4294901760, %v101_v2  ;;  %v98_v8 = vld [vmem:[#allocation2 + $0x50] sm:$0xff]  ;;  %v1062_v9 = vand.u32 4294901760, %v100_v6  ;;  %v1064_v10 = vand.u32 4294901760, %v99_v7  ;;  %v97_v12 = vld [vmem:[#allocation2 + $0x48] sm:$0xff]  ;;  %v96_v13 = vld [vmem:[#allocation2 + $0x40] sm:$0xff] }
  0x19   :  { %v1066_v11 = vand.u32 4294901760, %v98_v8  ;;  %106 = vmatpush.msra.mxu0 %v1056_v3  ;;  %v1070_v14 = vsub.f32 %v103_v0, %v1056_v3  ;;  %v1073_v15 = vsub.f32 %v102_v1, %v1058_v4  ;;  %302 = vmatpush.msra.mxu3 %v1056_v3  ;;  %v1079_v17 = vand.u32 4294901760, %v97_v12  ;;  %v95_v21 = vld [vmem:[#allocation2 + $0x38] sm:$0xff]  ;;  %v94_v34 = vld [vmem:[#allocation2 + $0x30] sm:$0xff]  ;;  %v93_v35 = vld [vmem:[#allocation2 + $0x28] sm:$0xff] }
  0x1a   :  { %v1077_v16 = vsub.f32 %v101_v2, %v1060_v5  ;;  %v1082_v18 = vsub.f32 %v100_v6, %v1062_v9  ;;  %v1085_v19 = vsub.f32 %v99_v7, %v1064_v10  ;;  %v1101_v25 = vand.u32 4294901760, %v96_v13  ;;  %v92_v42 = vld [vmem:[#allocation2 + $0x20] sm:$0xff]  ;;  %v91_v48 = vld [vmem:[#allocation2 + $0x18] sm:$0xff]  ;;  %v90_v54 = vld [vmem:[#allocation2 + $0x10] sm:$0xff] }
  0x1b   :  { %v1088_v20 = vsub.f32 %v98_v8, %v1066_v11  ;;  %249 = vmatpush.msra.mxu2 %v1070_v14  ;;  %108 = vmatpush.msra.mxu0 %v1058_v4  ;;  %v1093_v22 = vand.u32 4294901760, %v1070_v14  ;;  %v1096_v23 = vand.u32 4294901760, %v1073_v15  ;;  %v1111_v28 = vsub.f32 %v97_v12, %v1079_v17  ;;  %v89_v60 = vld [vmem:[#allocation2 + $0x8] sm:$0xff]  ;;  %v88_v1 = vld [vmem:[#allocation2] sm:$0xff] }
  0x1c   :  { %v1099_v24 = vand.u32 4294901760, %v1077_v16  ;;  %304 = vmatpush.msra.mxu3 %v1058_v4  ;;  %v1105_v26 = vand.u32 4294901760, %v1082_v18  ;;  %v1108_v27 = vand.u32 4294901760, %v1085_v19  ;;  %v1121_v32 = vand.u32 4294901760, %v95_v21 }
  0x1d   :  { %252 = vmatpush.msra.mxu2 %v1073_v15  ;;  %110 = vmatpush.msra.mxu0 %v1060_v5  ;;  %v149_v29 = vsub.f32 %v1070_v14, %v1093_v22  ;;  %v155_v30 = vsub.f32 %v1073_v15, %v1096_v23  ;;  %v1125_v33 = vand.u32 4294901760, %v1088_v20  ;;  %v1136_v39 = vsub.f32 %v96_v13, %v1101_v25 }
  0x1e   :  { %v161_v31 = vsub.f32 %v1077_v16, %v1099_v24  ;;  %306 = vmatpush.msra.mxu3 %v1060_v5  ;;  %v167_v38 = vsub.f32 %v1082_v18, %v1105_v26  ;;  %v173_v40 = vsub.f32 %v1085_v19, %v1108_v27  ;;  %v1142_v41 = vand.u32 4294901760, %v1111_v28 }
  0x1f   :  { %v1127_v36 = vand.u32 4294901760, %v149_v29  ;;  %255 = vmatpush.msra.mxu2 %v1077_v16  ;;  %112 = vmatpush.msra.mxu0 %v1062_v9  ;;  %v1131_v37 = vand.u32 4294901760, %v155_v30  ;;  %v1149_v44 = vsub.f32 %v95_v21, %v1121_v32  ;;  %v1151_v45 = vand.u32 4294901760, %v94_v34 }
  0x20   :  { %308 = vmatpush.msra.mxu3 %v1062_v9  ;;  %v1146_v43 = vand.u32 4294901760, %v161_v31  ;;  %v1153_v46 = vand.u32 4294901760, %v93_v35  ;;  %v179_v47 = vsub.f32 %v1088_v20, %v1125_v33  ;;  %v1161_v49 = vand.u32 4294901760, %v167_v38 }
  0x21   :  { %151 = vmatpush.msra.mxu1 %v1127_v36  ;;  %258 = vmatpush.msra.mxu2 %v1082_v18  ;;  %v1164_v50 = vand.u32 4294901760, %v1136_v39  ;;  %v1167_v51 = vsub.f32 %v94_v34, %v1151_v45  ;;  %v1169_v52 = vand.u32 4294901760, %v92_v42  ;;  %v185_v53 = vsub.f32 %v1111_v28, %v1142_v41 }
  0x22   :  { %114 = vmatpush.msra.mxu0 %v1064_v10  ;;  %310 = vmatpush.msra.mxu3 %v1064_v10  ;;  %v1177_v55 = vand.u32 4294901760, %v173_v40  ;;  %v1180_v56 = vand.u32 4294901760, %v1149_v44  ;;  %v1183_v57 = vsub.f32 %v93_v35, %v1153_v46  ;;  %v1185_v58 = vand.u32 4294901760, %v91_v48 }
  0x23   :  { %157 = vmatpush.msra.mxu1 %v1131_v37  ;;  %261 = vmatpush.msra.mxu2 %v1085_v19  ;;  %1469 = vst [vmem:[#allocation15_spill] sm:$0xff] %v1167_v51  ;;  %v1188_v59 = vand.u32 4294901760, %v179_v47  ;;  %v191_v61 = vsub.f32 %v1136_v39, %v1164_v50  ;;  %v1196_v62 = vand.u32 4294901760, %v1167_v51  ;;  %v1199_v63 = vsub.f32 %v92_v42, %v1169_v52 }
  0x24   :  { %116 = vmatpush.msra.mxu0 %v1066_v11  ;;  %312 = vmatpush.msra.mxu3 %v1066_v11  ;;  %1470 = vst [vmem:[#allocation16_spill] sm:$0xff] %v1183_v57  ;;  %v1201_v0 = vand.u32 4294901760, %v90_v54  ;;  %v1204_v2 = vand.u32 4294901760, %v185_v53  ;;  %v197_v6 = vsub.f32 %v1149_v44, %v1180_v56  ;;  %v1212_v7 = vand.u32 4294901760, %v1183_v57 }
  0x25   :  { %163 = vmatpush.msra.mxu1 %v1146_v43  ;;  %264 = vmatpush.msra.mxu2 %v1088_v20  ;;  %1471 = vst [vmem:[#allocation17_spill] sm:$0xff] %v1199_v63  ;;  %v1215_v8 = vsub.f32 %v91_v48, %v1185_v58  ;;  %v1217_v12 = vand.u32 4294901760, %v89_v60  ;;  %v1221_v13 = vand.u32 4294901760, %v88_v1  ;;  %v1225_v21 = vand.u32 4294901760, %v191_v61 }
  0x26   :  { %118 = vmatpush.msra.mxu0 %v1079_v17  ;;  %314 = vmatpush.msra.mxu3 %v1079_v17  ;;  %v203_v29 = vsub.f32 %v1167_v51, %v1196_v62  ;;  %v1230_v30 = vand.u32 4294901760, %v1199_v63  ;;  %v1233_v31 = vsub.f32 %v90_v54, %v1201_v0  ;;  %v1239_v34 = vand.u32 4294901760, %v197_v6  ;;  %v1274_v6 = vld [vmem:[#allocation5] sm:$0xff] }
  0x27   :  { %169 = vmatpush.msra.mxu1 %v1161_v49  ;;  %267 = vmatpush.msra.mxu2 %v1111_v28  ;;  %1472 = vst [vmem:[#allocation18_spill] sm:$0xff] %v1215_v8  ;;  %v209_v35 = vsub.f32 %v1183_v57, %v1212_v7  ;;  %v1244_v38 = vand.u32 4294901760, %v1215_v8  ;;  %v1247_v40 = vsub.f32 %v89_v60, %v1217_v12 }
  0x28   :  { %120 = vmatpush.msra.mxu0 %v1101_v25  ;;  %316 = vmatpush.msra.mxu3 %v1101_v25  ;;  %1473 = vst [vmem:[#allocation19_spill] sm:$0xff] %v1233_v31  ;;  %v1253_v42 = vand.u32 4294901760, %v203_v29  ;;  %v215_v47 = vsub.f32 %v1199_v63, %v1230_v30  ;;  %v1258_v48 = vand.u32 4294901760, %v1233_v31  ;;  %v1261_v53 = vsub.f32 %v88_v1, %v1221_v13  ;;  %v82_v1 = vld [vmem:[#allocation7] sm:$0xff] }
  0x29   :  { %175 = vmatpush.msra.mxu1 %v1177_v55  ;;  %270 = vmatpush.msra.mxu2 %v1136_v39  ;;  %v1267_v54 = vand.u32 4294901760, %v209_v35  ;;  %v221_v60 = vsub.f32 %v1215_v8, %v1244_v38  ;;  %v1272_v61 = vand.u32 4294901760, %v1247_v40 }
  0x2a   :  { %122 = vmatpush.msra.mxu0 %v1121_v32  ;;  %318 = vmatpush.msra.mxu3 %v1121_v32  ;;  %v1280_v29 = vand.u32 4294901760, %v215_v47  ;;  %v227_v35 = vsub.f32 %v1233_v31, %v1258_v48 }
  0x2b   :  { %181 = vmatpush.msra.mxu1 %v1188_v59  ;;  %273 = vmatpush.msra.mxu2 %v1149_v44  ;;  %v233_v47 = vsub.f32 %v1247_v40, %v1272_v61 }
  0x2c   :  { %124 = vmatpush.msra.mxu0 %v1151_v45  ;;  %320 = vmatpush.msra.mxu3 %v1151_v45 }
  0x2d   :  { %187 = vmatpush.msra.mxu1 %v1204_v2  ;;  %276 = vmatpush.msra.mxu2 %v1167_v51  ;;  %v1292_v51 = vand.u32 4294901760, %v221_v60 }
  0x2e   :  { %126 = vmatpush.msra.mxu0 %v1153_v46  ;;  %322 = vmatpush.msra.mxu3 %v1153_v46 }
  0x2f   :  { %193 = vmatpush.msra.mxu1 %v1225_v21  ;;  %279 = vmatpush.msra.mxu2 %v1183_v57  ;;  %v84_v57 = vsub.f32 %v1274_v6, %v82_v1 }
  0x30   :  { %128 = vmatpush.msra.mxu0 %v1169_v52  ;;  %324 = vmatpush.msra.mxu3 %v1169_v52 }
  0x31   :  { %199 = vmatpush.msra.mxu1 %v1239_v34  ;;  %282 = vmatpush.msra.mxu2 %v1199_v63  ;;  %v1285_v63 = vand.u32 4294901760, %v1261_v53  ;;  %v85_v60 = vadd.f32 1e-06, %v84_v57 }
  0x32   :  { %130 = vmatpush.msra.mxu0 %v1185_v58  ;;  %326 = vmatpush.msra.mxu3 %v1185_v58 }
  0x33   :  { %205 = vmatpush.msra.mxu1 %v1253_v42  ;;  %285 = vmatpush.msra.mxu2 %v1215_v8  ;;  %v1300_v8 = vand.u32 4294901760, %v227_v35  ;;  %v239_v1 = vsub.f32 %v1261_v53, %v1285_v63  ;;  %v104_v57 = vmul.f32 %v85_v60, %v85_v60 }
  0x34   :  { %132 = vmatpush.msra.mxu0 %v1201_v0  ;;  %328 = vmatpush.msra.mxu3 %v1201_v0 }
  0x35   :  { %211 = vmatpush.msra.mxu1 %v1267_v54  ;;  %288 = vmatpush.msra.mxu2 %v1233_v31  ;;  %v1308_v31 = vand.u32 4294901760, %v233_v47  ;;  %v1314_v35 = vand.u32 4294901760, %v239_v1 }
  0x36   :  { %134 = vmatpush.msra.mxu0 %v1217_v12  ;;  %330 = vmatpush.msra.mxu3 %v1217_v12 }
  0x37   :  { %217 = vmatpush.msra.mxu1 %v1280_v29  ;;  %291 = vmatpush.msra.mxu2 %v1247_v40 }
  0x38   :  { %136 = vmatpush.msra.mxu0 %v1221_v13  ;;  %332 = vmatpush.msra.mxu3 %v1221_v13 }
  0x39   :  { %223 = vmatpush.msra.mxu1 %v1292_v51  ;;  %294 = vmatpush.msra.mxu2 %v1261_v53 }
  0x3a   :  { %343 = vmatpush.msrb.mxu0 %v1093_v22  ;;  %493 = vmatpush.msrb.mxu3 %v1127_v36  ;;  %v1326_v36 = vand.u32 4294901760, %v104_v57 }
  0x3b   :  { %448 = vmatpush.msrb.mxu2 %v1056_v3  ;;  %229 = vmatpush.msra.mxu1 %v1300_v8 }
  0x3c   :  { %347 = vmatpush.msrb.mxu0 %v1096_v23  ;;  %499 = vmatpush.msrb.mxu3 %v1131_v37  ;;  %v138_v37 = vsub.f32 %v104_v57, %v1326_v36 }
  0x3d   :  { %450 = vmatpush.msrb.mxu2 %v1058_v4  ;;  %235 = vmatpush.msra.mxu1 %v1308_v31 }
  0x3e   :  { %351 = vmatpush.msrb.mxu0 %v1099_v24  ;;  %505 = vmatpush.msrb.mxu3 %v1146_v43  ;;  %v139_v43 = vand.u32 4294901760, %v138_v37 }
  0x3f   :  { %452 = vmatpush.msrb.mxu2 %v1060_v5  ;;  %241 = vmatpush.msra.mxu1 %v1314_v35 }
  0x40   :  { %355 = vmatpush.msrb.mxu0 %v1105_v26  ;;  %511 = vmatpush.msrb.mxu3 %v1161_v49  ;;  %v140_v49 = vsub.f32 %v138_v37, %v139_v43 }
  0x41   :  { %410 = vmatpush.msrb.mxu1 %v1056_v3  ;;  %454 = vmatpush.msrb.mxu2 %v1062_v9 }
  0x42   :  { %359 = vmatpush.msrb.mxu0 %v1108_v27  ;;  %517 = vmatpush.msrb.mxu3 %v1177_v55  ;;  %v141_v55 = vand.u32 4294901760, %v140_v49 }
  0x43   :  { %412 = vmatpush.msrb.mxu1 %v1058_v4  ;;  %456 = vmatpush.msrb.mxu2 %v1064_v10 }
  0x44   :  { %363 = vmatpush.msrb.mxu0 %v1125_v33  ;;  %523 = vmatpush.msrb.mxu3 %v1188_v59  ;;  %v83_v59 = vld [vmem:[#allocation8] sm:$0xff] }
  0x45   :  { %414 = vmatpush.msrb.mxu1 %v1060_v5  ;;  %458 = vmatpush.msrb.mxu2 %v1066_v11 }
  0x46   :  { %367 = vmatpush.msrb.mxu0 %v1142_v41  ;;  %529 = vmatpush.msrb.mxu3 %v1204_v2  ;;  %v86_v2 = vsub.f32 %v1274_v6, %v83_v59 }
  0x47   :  { %416 = vmatpush.msrb.mxu1 %v1062_v9  ;;  %460 = vmatpush.msrb.mxu2 %v1079_v17 }
  0x48   :  { %371 = vmatpush.msrb.mxu0 %v1164_v50  ;;  %535 = vmatpush.msrb.mxu3 %v1225_v21  ;;  %v87_v21 = vadd.f32 1e-06, %v86_v2 }
  0x49   :  { %418 = vmatpush.msrb.mxu1 %v1064_v10  ;;  %462 = vmatpush.msrb.mxu2 %v1101_v25 }
  0x4a   :  { %375 = vmatpush.msrb.mxu0 %v1180_v56  ;;  %541 = vmatpush.msrb.mxu3 %v1239_v34 }
  0x4b   :  { %420 = vmatpush.msrb.mxu1 %v1066_v11  ;;  %464 = vmatpush.msrb.mxu2 %v1121_v32 }
  0x4c   :  { %379 = vmatpush.msrb.mxu0 %v1196_v62  ;;  %547 = vmatpush.msrb.mxu3 %v1253_v42 }
  0x4d   :  { %422 = vmatpush.msrb.mxu1 %v1079_v17  ;;  %466 = vmatpush.msrb.mxu2 %v1151_v45 }
  0x4e   :  { %383 = vmatpush.msrb.mxu0 %v1212_v7  ;;  %553 = vmatpush.msrb.mxu3 %v1267_v54 }
  0x4f   :  { %424 = vmatpush.msrb.mxu1 %v1101_v25  ;;  %468 = vmatpush.msrb.mxu2 %v1153_v46 }
  0x50   :  { %387 = vmatpush.msrb.mxu0 %v1230_v30  ;;  %559 = vmatpush.msrb.mxu3 %v1280_v29 }
  0x51   :  { %426 = vmatpush.msrb.mxu1 %v1121_v32  ;;  %470 = vmatpush.msrb.mxu2 %v1169_v52 }
  0x52   :  { %297 = vmatmul.f32.vlgmr.msra.gmra.mxu2 %v138_v37  ;;  %391 = vmatpush.msrb.mxu0 %v1244_v38 }
  0x53   :  { %428 = vmatpush.msrb.mxu1 %v1151_v45  ;;  %472 = vmatpush.msrb.mxu2 %v1185_v58 }
  0x54   :  { %142 = vmatmul.f32.vlgmr.msra.gmra.mxu0 %v141_v55  ;;  %336 = vmatmul.f32.vlgmr.msra.gmra.mxu3 %v139_v43 }
  0x55   :  { %430 = vmatpush.msrb.mxu1 %v1153_v46  ;;  %395 = vmatpush.msrb.mxu0 %v1258_v48 }
  0x56   :  { %474 = vmatpush.msrb.mxu2 %v1201_v0  ;;  %565 = vmatpush.msrb.mxu3 %v1292_v51  ;;  %v446_v51 = vmul.f32 %v87_v21, %v87_v21 }
  0x57   :  { %432 = vmatpush.msrb.mxu1 %v1169_v52  ;;  %399 = vmatpush.msrb.mxu0 %v1272_v61 }
  0x58   :  { %243 = vmatmul.f32.vlgmr.msra.gmra.mxu1 %v1326_v36  ;;  %476 = vmatpush.msrb.mxu2 %v1217_v12 }
  0x59   :  { %434 = vmatpush.msrb.mxu1 %v1185_v58  ;;  %571 = vmatpush.msrb.mxu3 %v1300_v8 }
  0x5a   :  { %403 = vmatpush.msrb.mxu0 %v1285_v63  ;;  %478 = vmatpush.msrb.mxu2 %v1221_v13 }
  0x5b   :  { %436 = vmatpush.msrb.mxu1 %v1201_v0  ;;  %577 = vmatpush.msrb.mxu3 %v1308_v31  ;;  %v825_v31 = vlaneseq }
  0x5c   :  { %591 = vmatpush.msra.mxu0 %v1070_v14  ;;  %685 = vmatpush.msra.mxu2 %v1093_v22  ;;  %v1391_v14 = vand.u32 4294901760, %v446_v51 }
  0x5d   :  { %438 = vmatpush.msrb.mxu1 %v1217_v12  ;;  %583 = vmatpush.msrb.mxu3 %v1314_v35  ;;  %v826_v42 = vshrl.u32 %v825_v31, 7 }
  0x5e   :  { %405 = vmatmul.f32.vlgmr.msrb.gmra.mxu0 %v1326_v36  ;;  %689 = vmatpush.msra.mxu2 %v1096_v23 }
  0x5f   :  { %594 = vmatpush.msra.mxu0 %v1073_v15  ;;  %752 = vmatpush.msra.mxu3 %v1056_v3  ;;  %v480_v15 = vsub.f32 %v446_v51, %v1391_v14  ;;  %v832_v6 = vmul.u32 4, %v826_v42 }
  0x60   :  { %440 = vmatpush.msrb.mxu1 %v1221_v13  ;;  %693 = vmatpush.msra.mxu2 %v1099_v24 }
  0x61   :  { %442 = vmatmul.f32.vlgmr.msrb.gmra.mxu1 %v1326_v36  ;;  %597 = vmatpush.msra.mxu0 %v1077_v16  ;;  %v1477_v16 = vld [vmem:[#allocation18_spill] sm:$0xff] }
  0x62   :  { %644 = vmatpush.msra.mxu1 %v1056_v3  ;;  %754 = vmatpush.msra.mxu3 %v1058_v4  ;;  %v481_v3 = vand.u32 4294901760, %v480_v15 }
  0x63   :  { %600 = vmatpush.msra.mxu0 %v1082_v18  ;;  %697 = vmatpush.msra.mxu2 %v1105_v26 }
  0x64   :  { %646 = vmatpush.msra.mxu1 %v1058_v4  ;;  %756 = vmatpush.msra.mxu3 %v1060_v5  ;;  %v482_v4 = vsub.f32 %v480_v15, %v481_v3 }
  0x65   :  { %603 = vmatpush.msra.mxu0 %v1085_v19  ;;  %701 = vmatpush.msra.mxu2 %v1108_v27 }
  0x66   :  { %648 = vmatpush.msra.mxu1 %v1060_v5  ;;  %758 = vmatpush.msra.mxu3 %v1062_v9  ;;  %v1474_v5 = vld [vmem:[#allocation15_spill] sm:$0xff] }
  0x67   :  { %606 = vmatpush.msra.mxu0 %v1088_v20  ;;  %705 = vmatpush.msra.mxu2 %v1125_v33 }
  0x68   :  { %650 = vmatpush.msra.mxu1 %v1062_v9  ;;  %760 = vmatpush.msra.mxu3 %v1064_v10  ;;  %v1475_v9 = vld [vmem:[#allocation16_spill] sm:$0xff] }
  0x69   :  { %609 = vmatpush.msra.mxu0 %v1111_v28  ;;  %709 = vmatpush.msra.mxu2 %v1142_v41 }
  0x6a   :  { %652 = vmatpush.msra.mxu1 %v1064_v10  ;;  %762 = vmatpush.msra.mxu3 %v1066_v11  ;;  %v483_v10 = vand.u32 4294901760, %v482_v4 }
  0x6b   :  { %612 = vmatpush.msra.mxu0 %v1136_v39  ;;  %713 = vmatpush.msra.mxu2 %v1164_v50 }
  0x6c   :  { %654 = vmatpush.msra.mxu1 %v1066_v11  ;;  %764 = vmatpush.msra.mxu3 %v1079_v17  ;;  %v1476_v11 = vld [vmem:[#allocation17_spill] sm:$0xff] }
  0x6d   :  { %615 = vmatpush.msra.mxu0 %v1149_v44  ;;  %717 = vmatpush.msra.mxu2 %v1180_v56 }
  0x6e   :  { %656 = vmatpush.msra.mxu1 %v1079_v17  ;;  %766 = vmatpush.msra.mxu3 %v1101_v25  ;;  %v1478_v17 = vld [vmem:[#allocation19_spill] sm:$0xff] }
  0x6f   :  { %618 = vmatpush.msra.mxu0 %v1474_v5  ;;  %721 = vmatpush.msra.mxu2 %v1196_v62 }
  0x70   :  { %658 = vmatpush.msra.mxu1 %v1101_v25  ;;  %768 = vmatpush.msra.mxu3 %v1121_v32 }
  0x71   :  { %621 = vmatpush.msra.mxu0 %v1475_v9  ;;  %725 = vmatpush.msra.mxu2 %v1212_v7 }
  0x72   :  { %660 = vmatpush.msra.mxu1 %v1121_v32  ;;  %770 = vmatpush.msra.mxu3 %v1151_v45 }
  0x73   :  { %624 = vmatpush.msra.mxu0 %v1476_v11  ;;  %729 = vmatpush.msra.mxu2 %v1230_v30 }
  0x74   :  { %662 = vmatpush.msra.mxu1 %v1151_v45  ;;  %772 = vmatpush.msra.mxu3 %v1153_v46 }
  0x75   :  { %484 = vmatmul.f32.vlgmr.msrb.gmra.mxu2 %v483_v10  ;;  %585 = vmatmul.f32.vlgmr.msrb.gmra.mxu3 %v1391_v14 }
  0x76   :  { %627 = vmatpush.msra.mxu0 %v1477_v16  ;;  %664 = vmatpush.msra.mxu1 %v1153_v46 }
  0x77   :  { %733 = vmatpush.msra.mxu2 %v1244_v38  ;;  %774 = vmatpush.msra.mxu3 %v1169_v52 }
  0x78   :  { %630 = vmatpush.msra.mxu0 %v1478_v17  ;;  %666 = vmatpush.msra.mxu1 %v1169_v52 }
  0x79   :  { %737 = vmatpush.msra.mxu2 %v1258_v48  ;;  %776 = vmatpush.msra.mxu3 %v1185_v58  ;;  %v828_v48 = vand.u32 127, %v825_v31 }
  0x7a   :  { %633 = vmatpush.msra.mxu0 %v1247_v40  ;;  %668 = vmatpush.msra.mxu1 %v1185_v58 }
  0x7b   :  { %741 = vmatpush.msra.mxu2 %v1272_v61  ;;  %778 = vmatpush.msra.mxu3 %v1201_v0  ;;  %v837_v29 = vand.u32 3, %v828_v48 }
  0x7c   :  { %636 = vmatpush.msra.mxu0 %v1261_v53  ;;  %670 = vmatpush.msra.mxu1 %v1201_v0 }
  0x7d   :  { %745 = vmatpush.msra.mxu2 %v1285_v63  ;;  %780 = vmatpush.msra.mxu3 %v1217_v12  ;;  %v845_v43 = vadd.s32 %v837_v29, %v832_v6 }
  0x7e   :  { %639 = vmatmul.f32.vlgmr.msra.gmra.mxu0 %v480_v15  ;;  %747 = vmatmul.f32.vlgmr.msra.gmra.mxu2 %v1391_v14 }
  0x7f   :  { %672 = vmatpush.msra.mxu1 %v1217_v12  ;;  %782 = vmatpush.msra.mxu3 %v1221_v13  ;;  %vm846_vm4 = vcmp.lt.s32.totalorder %v845_v43, 10 }
  0x80   :  { %784 = vmatmul.f32.vlgmr.msra.gmra.mxu3 %v1391_v14 }
  0x81   :  { %674 = vmatpush.msra.mxu1 %v1221_v13 }
  0x82   :  { %678 = vmatmul.f32.vlgmr.msra.gmra.mxu1 %v481_v3 }
  0xd1   :  { %v143_v19 = vpop.f32.mrf.mxu0 }
  0xd5   :  { %v244_v18 = vpop.f32.mrf.mxu1  ;;  %v298_v22 = vpop.f32.mrf.mxu2 }
  0xd6   :  { %v245_v20 = vadd.f32 %v244_v18, %v143_v19 }
  0xd7   :  { %v337_v24 = vpop.f32.mrf.mxu3 }
  0xd8   :  { %v299_v23 = vadd.f32 %v298_v22, %v245_v20 }
  0xda   :  { %v338_v25 = vadd.f32 %v337_v24, %v299_v23 }
  0xdb   :  { %v406_v26 = vpop.f32.mrf.mxu0 }
  0xdc   :  { %v407_v27 = vadd.f32 %v406_v26, %v338_v25 }
  0xde   :  { %v443_v28 = vpop.f32.mrf.mxu1 }
  0xdf   :  { %v444_v32 = vadd.f32 %v443_v28, %v407_v27 }
  0xe1   :  { %878 = vrsqrt.f32 %v444_v32  ;;  %vm795_vm0 = vcmp.eq.f32.partialorder %v444_v32, inf  ;;  %v798_v60 = vand.u32 2147483648, %v444_v32  ;;  %vm797_vm2 = vcmp.eq.f32.partialorder %v444_v32, 0.0 }
  0xe7   :  { %v879_v45 = vpop.eup %878 }
  0xe8   :  { %v789_v52 = vmul.f32 %v879_v45, %v444_v32 }
  0xea   :  { %v790_v0 = vmul.f32 %v879_v45, %v789_v52 }
  0xec   :  { %v791_v8 = vmul.f32 0.5, %v790_v0 }
  0xee   :  { %v792_v12 = vsub.f32 1.5, %v791_v8 }
  0xf0   :  { %v793_v34 = vmul.f32 %v879_v45, %v792_v12 }
  0xf2   :  { %v794_v53 = vmul.f32 %v793_v34, %v444_v32 }
  0xf4   :  { %v796_v47 = vsel %vm795_vm0, %v444_v32, %v794_v53 }
  0xf5   :  { %v799_v36 = vsel %vm797_vm2, %v798_v60, %v796_v47 }
  0xf8   :  { %v485_v33 = vpop.f32.mrf.mxu2  ;;  %v586_v39 = vpop.f32.mrf.mxu3 }
  0xf9   :  { %v587_v41 = vadd.f32 %v586_v39, %v485_v33 }
  0xfb   :  { %v640_v44 = vpop.f32.mrf.mxu0 }
  0xfc   :  { %v641_v46 = vadd.f32 %v640_v44, %v587_v41 }
  0xff   :  { %v679_v50 = vpop.f32.mrf.mxu1 }
 0x100   :  { %v680_v56 = vadd.f32 %v679_v50, %v641_v46 }
 0x101   :  { %v748_v58 = vpop.f32.mrf.mxu2 }
 0x102   :  { %v749_v62 = vadd.f32 %v748_v58, %v680_v56 }
 0x103   :  { %v785_v63 = vpop.f32.mrf.mxu3 }
 0x104   :  { %v786_v7 = vadd.f32 %v785_v63, %v749_v62 }
 0x106   :  { %880 = vrsqrt.f32 %v786_v7  ;;  %vm807_vm1 = vcmp.eq.f32.partialorder %v786_v7, inf  ;;  %v810_v35 = vand.u32 2147483648, %v786_v7  ;;  %vm809_vm3 = vcmp.eq.f32.partialorder %v786_v7, 0.0 }
 0x10c   :  { %v881_v13 = vpop.eup %880 }
 0x10d   :  { %v801_v30 = vmul.f32 %v881_v13, %v786_v7 }
 0x10f   :  { %v802_v38 = vmul.f32 %v881_v13, %v801_v30 }
 0x111   :  { %v803_v40 = vmul.f32 0.5, %v802_v38 }
 0x113   :  { %v804_v54 = vsub.f32 1.5, %v803_v40 }
 0x115   :  { %v805_v61 = vmul.f32 %v881_v13, %v804_v54 }
 0x117   :  { %v806_v1 = vmul.f32 %v805_v61, %v786_v7 }
 0x119   :  { %v808_v57 = vsel %vm807_vm1, %v786_v7, %v806_v1 }
 0x11a   :  { %v811_v37 = vsel %vm809_vm3, %v810_v35, %v808_v57 }
 0x11b   :  { %v812_v49 = vsub.f32 %v799_v36, %v811_v37 }
 0x11d   :  { %v813_v55 = vadd.f32 1.0, %v812_v49 }
 0x11f   :  { %v814_v59 = vmax.f32 %v813_v55, 0.0 }
 0x121   :  { %v847_v2 = vsel %vm846_vm4, %v814_v59, 0.0 }
 0x122   :  { %849 = vst [vmem:[#allocation10] sm:$0xff] %v847_v2 }
 0x123   :  { %860 = dma.vmem_to_hbm [thread:$0]  %s856_s3, 128, %s858_s13, [#allocation4]  }
 0x124   :  { %1008 = dma.done.wait [#allocation4], 128  }
 0x125   :  { %1009 = vsyncadd [#allocation4], 4294967168 }
 0x126   :  { %865 = vsyncpa [#allocation3], 1 }
 0x127   :  { %866 = vsyncpa [#allocation6], 1 }
 0x128   :  { %867 = vsyncpa [#allocation9], 1 }
 0x129   :  { %868 = vsyncpa [#allocation4], 1 }

</bundles_post_ra>
